<compile_context>
chip_gen: v6e
topology: v6e:2x2x1
jax: 0.10.0
libtpu: 0.0.40
codegen_flags: <defaults>
</compile_context>

<pallas_src>
import functools

import jax
import jax.numpy as jnp
from jax.experimental import pallas as pl
from jax.experimental.pallas import tpu as pltpu


def _round_up(x, m):
    return (x + m - 1) // m * m


def _pick_tile(padded_dim, candidates):
    for c in candidates:
        if padded_dim % c == 0:
            return c
    return 128  # padded_dim is always a multiple of 128


# ---------------------------------------------------------------------------
# Pallas kernel: tiled matmul with fused BN scale/bias (+ residual) (+ ReLU)
# ---------------------------------------------------------------------------
def _fused_matmul_kernel(*refs, relu, has_residual):
    if has_residual:
        a_ref, b_ref, scale_ref, bias_ref, res_ref, o_ref = refs
    else:
        a_ref, b_ref, scale_ref, bias_ref, o_ref = refs
        res_ref = None

    k = pl.program_id(2)

    @pl.when(k == 0)
    def _():
        o_ref[...] = jnp.zeros_like(o_ref)

    # bf16 x bf16 -> f32 accumulation directly into the resident output block.
    o_ref[...] += jnp.dot(a_ref[...], b_ref[...], preferred_element_type=jnp.float32)

    @pl.when(k == pl.num_programs(2) - 1)
    def _():
        out = o_ref[...] * scale_ref[...] + bias_ref[...]
        if has_residual:
            out = out + res_ref[...]
        if relu:
            out = jnp.maximum(out, 0.0)
        o_ref[...] = out


def fused_matmul(a, w_p, scale_p, bias_p, n_out, *, relu=False, residual=None):
    """out[:M,:n_out] = maybe_relu((a @ w) * scale + bias (+ residual)).

    a:        [M, K]  (any float dtype, cast to bf16 here)
    w_p:      [Kp, Np] bf16, pre-padded (Kp, Np multiples of 128)
    scale_p:  [1, Np]  f32, pre-padded
    bias_p:   [1, Np]  f32, pre-padded
    residual: optional [M, n_out] f32, fused into the epilogue
    """
    M, K = a.shape
    Kp, Np = w_p.shape
    assert K <= Kp and n_out <= Np

    TM = min(128, _round_up(M, 8))
    Mp = _round_up(M, TM)
    TN = _pick_tile(Np, (256, 128))
    TK = _pick_tile(Kp, (512, 256, 128))

    a_bf = a.astype(jnp.bfloat16)
    if (Mp, Kp) != (M, K):
        a_bf = jnp.pad(a_bf, ((0, Mp - M), (0, Kp - K)))

    has_residual = residual is not None
    in_specs = [
        pl.BlockSpec((TM, TK), lambda i, j, k: (i, k)),
        pl.BlockSpec((TK, TN), lambda i, j, k: (k, j)),
        pl.BlockSpec((1, TN), lambda i, j, k: (0, j)),
        pl.BlockSpec((1, TN), lambda i, j, k: (0, j)),
    ]
    inputs = [a_bf, w_p, scale_p, bias_p]
    if has_residual:
        r = residual.astype(jnp.float32)
        if (Mp, Np) != r.shape:
            r = jnp.pad(r, ((0, Mp - r.shape[0]), (0, Np - r.shape[1])))
        in_specs.append(pl.BlockSpec((TM, TN), lambda i, j, k: (i, j)))
        inputs.append(r)

    out = pl.pallas_call(
        functools.partial(_fused_matmul_kernel, relu=relu, has_residual=has_residual),
        out_shape=jax.ShapeDtypeStruct((Mp, Np), jnp.float32),
        grid_spec=pltpu.PrefetchScalarGridSpec(
            num_scalar_prefetch=0,
            grid=(Mp // TM, Np // TN, Kp // TK),
            in_specs=in_specs,
            out_specs=pl.BlockSpec((TM, TN), lambda i, j, k: (i, j)),
        ),
        compiler_params=pltpu.CompilerParams(
            dimension_semantics=("parallel", "parallel", "arbitrary")
        ),
    )(*inputs)
    return out[:M, :n_out]


# ---------------------------------------------------------------------------
# Plain-JAX glue (layout plumbing only: patch extraction, pooling, concat)
# ---------------------------------------------------------------------------
def im2col(x, kh, kw, stride, pad):
    """x: [N,H,W,C] -> bf16 patches [N,Ho,Wo,kh*kw*C] (pure strided slicing)."""
    n, h, w, c = x.shape
    ho = (h + 2 * pad - kh) // stride + 1
    wo = (w + 2 * pad - kw) // stride + 1
    xp = jnp.pad(x.astype(jnp.bfloat16), ((0, 0), (pad, pad), (pad, pad), (0, 0)))
    cols = [xp[:, i:i + stride * ho:stride, j:j + stride * wo:stride, :]
            for i in range(kh) for j in range(kw)]
    return jnp.concatenate(cols, axis=-1), ho, wo


def conv_bn(x, cp, residual=None):
    """x: [N,H,W,Cin] -> [N,Ho,Wo,Cout] via im2col + fused Pallas matmul."""
    kh, kw, cin, cout = cp["kh"], cp["kw"], cp["cin"], cp["cout"]
    patches, ho, wo = im2col(x, kh, kw, cp["stride"], cp["pad"])
    n = x.shape[0]
    a = patches.reshape(n * ho * wo, kh * kw * cin)
    res2d = None
    if residual is not None:
        res2d = residual.reshape(n * ho * wo, cout)
    out = fused_matmul(a, cp["w"], cp["scale"], cp["bias"], cout,
                       relu=cp["relu"], residual=res2d)
    return out.reshape(n, ho, wo, cout)


def maxpool_3x3_s2_p1(x):
    n, h, w, c = x.shape
    ho = (h + 2 - 3) // 2 + 1
    wo = (w + 2 - 3) // 2 + 1
    xp = jnp.pad(x, ((0, 0), (1, 1), (1, 1), (0, 0)), constant_values=-jnp.inf)
    out = None
    for i in range(3):
        for j in range(3):
            s = xp[:, i:i + 2 * ho:2, j:j + 2 * wo:2, :]
            out = s if out is None else jnp.maximum(out, s)
    return out


# ---------------------------------------------------------------------------
# Parameters (deterministic synthetic init, pre-padded / pre-folded ONCE)
# ---------------------------------------------------------------------------
def make_params(key):
    keys = iter(jax.random.split(key, 64))

    def conv_params(kh, kw, cin, cout, stride, pad, relu):
        std = (2.0 / (kh * kw * cin)) ** 0.5
        w = jax.random.normal(next(keys), (kh, kw, cin, cout), jnp.float32) * std
        # Fold eval-mode BatchNorm (gamma=1, beta=0, running mean=0, var=1, eps=1e-5).
        scale = jnp.ones((cout,), jnp.float32) / jnp.sqrt(1.0 + 1e-5)
        bias = jnp.zeros((cout,), jnp.float32)
        K = kh * kw * cin
        Kp, Np = _round_up(K, 128), _round_up(cout, 128)
        w_p = jnp.zeros((Kp, Np), jnp.bfloat16).at[:K, :cout].set(
            w.reshape(K, cout).astype(jnp.bfloat16))
        s_p = jnp.zeros((1, Np), jnp.float32).at[0, :cout].set(scale)
        b_p = jnp.zeros((1, Np), jnp.float32).at[0, :cout].set(bias)
        return {"w": w_p, "scale": s_p, "bias": b_p, "kh": kh, "kw": kw,
                "cin": cin, "cout": cout, "stride": stride, "pad": pad, "relu": relu}

    def linear_params(cin, cout, relu):
        bound = (1.0 / cin) ** 0.5
        w = jax.random.uniform(next(keys), (cin, cout), jnp.float32, -bound, bound)
        b = jax.random.uniform(next(keys), (cout,), jnp.float32, -bound, bound)
        Kp, Np = _round_up(cin, 128), _round_up(cout, 128)
        w_p = jnp.zeros((Kp, Np), jnp.bfloat16).at[:cin, :cout].set(w.astype(jnp.bfloat16))
        s_p = jnp.zeros((1, Np), jnp.float32).at[0, :cout].set(jnp.ones((cout,), jnp.float32))
        b_p = jnp.zeros((1, Np), jnp.float32).at[0, :cout].set(b)
        return {"w": w_p, "scale": s_p, "bias": b_p, "cin": cin, "cout": cout, "relu": relu}

    resnet = {"conv1": conv_params(7, 7, 3, 64, 2, 3, True), "stages": []}
    cin = 64
    for cout, first_stride in [(64, 1), (128, 2), (256, 2), (512, 2)]:
        stage = []
        for b_i in range(2):
            s = first_stride if b_i == 0 else 1
            blk = {
                "conv1": conv_params(3, 3, cin, cout, s, 1, True),
                # conv2: ReLU applied AFTER the fused residual add in the matmul epilogue.
                "conv2": conv_params(3, 3, cout, cout, 1, 1, True),
            }
            if s != 1 or cin != cout:
                blk["down"] = conv_params(1, 1, cin, cout, s, 0, False)
            stage.append(blk)
            cin = cout
        resnet["stages"].append(stage)

    return {
        "resnet": resnet,
        "mlp": [linear_params(1404, 512, True), linear_params(512, 128, True)],
        "cls": [linear_params(512 + 128, 256, True), linear_params(256, 2, False)],
    }


# ---------------------------------------------------------------------------
# Forward pass
# ---------------------------------------------------------------------------
def resnet18_forward(p, image_nchw):
    x = jnp.transpose(image_nchw, (0, 2, 3, 1)).astype(jnp.float32)  # NCHW -> NHWC
    x = conv_bn(x, p["conv1"])
    x = maxpool_3x3_s2_p1(x)
    for stage in p["stages"]:
        for blk in stage:
            identity = x
            if "down" in blk:
                identity = conv_bn(x, blk["down"])
            out = conv_bn(x, blk["conv1"])
            # Second conv: residual add + ReLU fused into the matmul epilogue.
            x = conv_bn(out, blk["conv2"], residual=identity)
    return jnp.mean(x, axis=(1, 2))  # global average pool -> [N, 512]


def model_forward(params, image, landmarks):
    cnn_feat = resnet18_forward(params["resnet"], image)            # [N, 512]

    h = landmarks.astype(jnp.float32)
    for lp in params["mlp"]:
        h = fused_matmul(h, lp["w"], lp["scale"], lp["bias"], lp["cout"], relu=lp["relu"])
    # h: [N, 128]

    fused = jnp.concatenate([cnn_feat, h], axis=1)                  # [N, 640]

    z = fused
    for lp in params["cls"]:
        z = fused_matmul(z, lp["w"], lp["scale"], lp["bias"], lp["cout"], relu=lp["relu"])
    return z                                                        # [N, 2]


if __name__ == "__main__":
    key = jax.random.PRNGKey(0)
    k_params, k_img, k_lmk = jax.random.split(key, 3)

    params = make_params(k_params)
    image = jax.random.normal(k_img, (2, 3, 32, 32), jnp.float32)       # NCHW
    landmarks = jax.random.normal(k_lmk, (2, 1404), jnp.float32)

    out = model_forward(params, image, landmarks)
    out = jax.block_until_ready(out)
    assert out.shape == (2, 2) and out.dtype == jnp.float32
    print("KERNEL_OK")
</pallas_src>

<mosaic_0001>
module attributes {stable_mosaic.version = 11 : i64} {
  func.func @_fused_matmul_kernel(%arg0: i32, %arg1: i32, %arg2: i32, %arg3: memref<128x256xbf16, #tpu.memory_space<vmem>>, %arg4: memref<256x128xbf16, #tpu.memory_space<vmem>>, %arg5: memref<1x128xf32, #tpu.memory_space<vmem>>, %arg6: memref<1x128xf32, #tpu.memory_space<vmem>>, %arg7: memref<128x128xf32, #tpu.memory_space<vmem>>) attributes {dimension_semantics = [#tpu.dimension_semantics<parallel>, #tpu.dimension_semantics<parallel>, #tpu.dimension_semantics<arbitrary>], iteration_bounds = array<i64: 4, 1, 1>, scalar_prefetch = 0 : i64, scratch_operands = 0 : i64, tpu.core_type = #tpu.core_type<tc>, window_params = [{transform_indices = @transform_0, window_bounds = array<i64: 128, 256>}, {transform_indices = @transform_1, window_bounds = array<i64: 256, 128>}, {transform_indices = @transform_2, window_bounds = array<i64: 1, 128>}, {transform_indices = @transform_3, window_bounds = array<i64: 1, 128>}, {transform_indices = @transform_4, window_bounds = array<i64: 128, 128>}]} {
    %c0_i32 = arith.constant 0 : i32
    %0 = arith.cmpi eq, %arg2, %c0_i32 : i32
    %1 = arith.extui %0 : i1 to i32
    %c0_i32_0 = arith.constant 0 : i32
    %2 = arith.cmpi ne, %1, %c0_i32_0 : i32
    scf.if %2 {
      %cst_10 = arith.constant 0.000000e+00 : f32
      %12 = vector.broadcast %cst_10 : f32 to vector<128x128xf32>
      %c0_11 = arith.constant 0 : index
      %c0_12 = arith.constant 0 : index
      %13 = vector.load %arg7[%c0_11, %c0_12] : memref<128x128xf32, #tpu.memory_space<vmem>>, vector<128x128xf32>
      tpu.vector_store %arg7[%c0_11, %c0_12], %12 {strides = array<i32>} : memref<128x128xf32, #tpu.memory_space<vmem>>, vector<128x128xf32>,
    } else {
    }
    %c0 = arith.constant 0 : index
    %c0_1 = arith.constant 0 : index
    %3 = vector.load %arg7[%c0, %c0_1] : memref<128x128xf32, #tpu.memory_space<vmem>>, vector<128x128xf32>
    %c0_2 = arith.constant 0 : index
    %c0_3 = arith.constant 0 : index
    %4 = vector.load %arg3[%c0_2, %c0_3] : memref<128x256xbf16, #tpu.memory_space<vmem>>, vector<128x256xbf16>
    %c0_4 = arith.constant 0 : index
    %c0_5 = arith.constant 0 : index
    %5 = vector.load %arg4[%c0_4, %c0_5] : memref<256x128xbf16, #tpu.memory_space<vmem>>, vector<256x128xbf16>
    %cst = arith.constant dense<0.000000e+00> : vector<128x128xf32>
    %6 = tpu.matmul %4, %5, %cst {dimension_numbers = #tpu.dot_dimension_numbers<[1], [0], [0], [1], [0, 0, 1, 1], [], []>} : vector<128x256xbf16>, vector<256x128xbf16>, vector<128x128xf32> -> vector<128x128xf32>
    %7 = arith.addf %3, %6 : vector<128x128xf32>
    %c0_6 = arith.constant 0 : index
    %c0_7 = arith.constant 0 : index
    %8 = vector.load %arg7[%c0_6, %c0_7] : memref<128x128xf32, #tpu.memory_space<vmem>>, vector<128x128xf32>
    tpu.vector_store %arg7[%c0_6, %c0_7], %7 {strides = array<i32>} : memref<128x128xf32, #tpu.memory_space<vmem>>, vector<128x128xf32>,
    %c0_i32_8 = arith.constant 0 : i32
    %9 = arith.cmpi eq, %arg2, %c0_i32_8 : i32
    %10 = arith.extui %9 : i1 to i32
    %c0_i32_9 = arith.constant 0 : i32
    %11 = arith.cmpi ne, %10, %c0_i32_9 : i32
    scf.if %11 {
      %c0_10 = arith.constant 0 : index
      %c0_11 = arith.constant 0 : index
      %12 = vector.load %arg7[%c0_10, %c0_11] : memref<128x128xf32, #tpu.memory_space<vmem>>, vector<128x128xf32>
      %c0_12 = arith.constant 0 : index
      %c0_13 = arith.constant 0 : index
      %13 = vector.load %arg5[%c0_12, %c0_13] : memref<1x128xf32, #tpu.memory_space<vmem>>, vector<1x128xf32>
      %14 = vector.broadcast %13 : vector<1x128xf32> to vector<128x128xf32>
      %15 = arith.mulf %12, %14 : vector<128x128xf32>
      %c0_14 = arith.constant 0 : index
      %c0_15 = arith.constant 0 : index
      %16 = vector.load %arg6[%c0_14, %c0_15] : memref<1x128xf32, #tpu.memory_space<vmem>>, vector<1x128xf32>
      %17 = vector.broadcast %16 : vector<1x128xf32> to vector<128x128xf32>
      %18 = arith.addf %15, %17 : vector<128x128xf32>
      %cst_16 = arith.constant 0.000000e+00 : f32
      %19 = vector.broadcast %cst_16 : f32 to vector<128x128xf32>
      %20 = arith.maximumf %18, %19 : vector<128x128xf32>
      %c0_17 = arith.constant 0 : index
      %c0_18 = arith.constant 0 : index
      %21 = vector.load %arg7[%c0_17, %c0_18] : memref<128x128xf32, #tpu.memory_space<vmem>>, vector<128x128xf32>
      tpu.vector_store %arg7[%c0_17, %c0_18], %20 {strides = array<i32>} : memref<128x128xf32, #tpu.memory_space<vmem>>, vector<128x128xf32>,
    } else {
    }
    return
  }
  func.func @transform_0(%arg0: i32, %arg1: i32, %arg2: i32) -> (i32, i32) {
    %c0_i32 = arith.constant 0 : i32
    return %arg0, %arg2 : i32, i32
  }
  func.func @transform_1(%arg0: i32, %arg1: i32, %arg2: i32) -> (i32, i32) {
    %c0_i32 = arith.constant 0 : i32
    return %arg2, %arg1 : i32, i32
  }
  func.func @transform_2(%arg0: i32, %arg1: i32, %arg2: i32) -> (i32, i32) {
    %c0_i32 = arith.constant 0 : i32
    %c0_i32_0 = arith.constant 0 : i32
    return %c0_i32, %arg1 : i32, i32
  }
  func.func @transform_3(%arg0: i32, %arg1: i32, %arg2: i32) -> (i32, i32) {
    %c0_i32 = arith.constant 0 : i32
    %c0_i32_0 = arith.constant 0 : i32
    return %c0_i32, %arg1 : i32, i32
  }
  func.func @transform_4(%arg0: i32, %arg1: i32, %arg2: i32) -> (i32, i32) {
    %c0_i32 = arith.constant 0 : i32
    return %arg0, %arg1 : i32, i32
  }
}

</mosaic_0001>

<bundles_post_ra>
// kernel: tpu_custom_call.1
= control target key start
LH: loop header
LB: loop body
LE: loop exit
PB: predicated region body
PF: predicated region fallthrough
CT: control target
= control target key end

     0   :  { %s1622_s0 = inlined_call_operand.hbm [shape: bf16[512,256], index: 0, kind: input, shape index: {}]   ;;  %s1623_s1 = inlined_call_operand.hbm [shape: bf16[256,128], index: 1, kind: input, shape index: {}]   ;;  %s1624_s2 = inlined_call_operand.vmem [shape: f32[1,128], index: 2, kind: input, shape index: {}]   ;;  %s1625_s3 = inlined_call_operand.vmem [shape: f32[1,128], index: 3, kind: input, shape index: {}]   ;;  %s1626_s4 = inlined_call_operand.hbm [shape: f32[512,128], index: 4, kind: output, shape index: {}]  }
   0x1   :  { %1628 = sst [smem:[#allocation11_spill]] %s1623_s1 }
   0x2   :  { %9 = vsyncpa [#allocation3], 0 }
   0x3   :  { %11 = vsyncpa [#allocation3 + $0x1], 0 }
   0x4   :  { %12 = vsyncpa [#allocation6], 0 }
   0x5   :  { %13 = vsyncpa [#allocation4], 0 }
   0x6   :  { %15 = vsyncpa [#allocation4 + $0x1], 0  ;;  %s1360_s15 = smov 0   ;;  %s1362_s16 = smov 0  }
   0x7   :  { %s1364_s17 = smov 0   ;;  %s1366_s18 = smov 0  }
   0x8   :  { %s1368_s19 = smov 0   ;;  %s1370_s20 = smov 0  }
   0x9 LB: > { %s929_s21 = sadd.s32 4294967295, %s1324_s20   ;;  %s930_s22 = sadd.s32 4294967294, %s1324_s20   ;;  %s1324_s20 = sphi %s1370_s20, %s21_s20   ;;  %s1320_s19 = sphi %s1368_s19, %s1645_s19   ;;  %s1316_s18 = sphi %s1366_s18, %s1644_s18   ;;  %s1312_s17 = sphi %s1364_s17, %s1643_s17   ;;  %s1308_s16 = sphi %s1362_s16, %s1642_s16   ;;  %s1304_s15 = sphi %s1360_s15, %s1641_s15  }
   0xa   : > { %p62_p0 = scmp.ne.s32.totalorder %s1308_s16, %s1304_s15  ;;  %p1394_p1 = scmp.eq.s32.totalorder %s929_s21, 0 }
   0xb   : > { %p1398_p2 = scmp.eq.s32.totalorder %s929_s21, 3  ;;  %p174_p3 = scmp.eq.s32.totalorder %s930_s22, 3 }
   0xc   : > { %p1404_p4 = por %p1394_p1, %p62_p0  ;;  %p931_p5 = scmp.ge.s32.totalorder %s1324_s20, 1 }
   0xd   : > { %p1409_p6 = por %p174_p3, %p62_p0  ;;  %p181_p7 = scmp.lt.s32.totalorder %s1324_s20, 5 }
   0xe   : > { %s1326_s28 = smov [#allocation5]   ;;  %s40_s5 = sadd.s32 1, %s1320_s19 }
   0xf   : > { %s1632_s26 = scalar_select %p1409_p6, 1, 0 }
  0x10   : > { %p1414_p8 = pnand %p931_p5, %p181_p7  ;;  %s197_s29 = sshll.u32 %s1326_s28, 4  ;;  %s198_s29 = int_to_ptr.vmem [resolvable:$true] %s197_s29 }
  0x11   : > { %s1197_s6 = scalar_lea.vmem %s198_s29, 2048  ;;  %p1205_p3 = scmp.lt.s32.totalorder %s198_s29, %s198_s29 }
  0x12   : > { %p1074_p9 = pneg %p1414_p8  ;;  %p1198_p12 = scmp.ne.s32.totalorder %s198_s29, %s1197_s6 }
  0x13   : > { %p1206_p5 = scmp.lt.s32.totalorder %s1197_s6, %s1197_s6 }
  0x14   : > { %p1422_p10 = pnand %p1074_p9, %p1394_p1 }
  0x15   : > { %p1207_p7 = por %p1206_p5, %p1205_p3 }
  0x16   : > { %p1188_p11 = pneg %p1422_p10 }
  0x18   : > { %p1200_p13 = pnand %p1198_p12, %p1188_p11 }
  0x1a   : > { %p1201_p0 = pneg %p1200_p13 }
  0x1c   : > { %p1208_p6 = pnand %p1207_p7, %p1201_p0 }
  0x1e   : > { %1211 = shalt.err (!%p1208_p6)
}
  0x1f   : > { %s1327_s7 = smov 64   ;;  %s1328_s8 = smov 4  }
  0x20   : > { %s1635_s1 = sld [smem:[#allocation11_spill]]  ;;  %p42_p9 = scmp.ge.s32.totalorder %s40_s5, 4 }
  0x21   : > { %s49_s11 = sadd.s32 1, %s1312_s17  ;;  %p56_p6 = scmp.ne.s32.totalorder %s1312_s17, %s1308_s16 }
  0x22   : > { %p57_p11 = scmp.eq.s32.totalorder %s1324_s20, 0  ;;  %s1647_s5 = smov (%p42_p9, %s40_s5), 0 }
  0x23   : > { %p1446_p13 = por %p1398_p2, %p56_p6  ;;  %s44_s14 = ssub.s32 %s1320_s19, %s1647_s5 }
  0x24   : > { %p1440_p12 = por %p57_p11, %p56_p6  ;;  %p1087_p0 = scmp.lt.s32.totalorder %s1324_s20, 4 }
  0x25   : > { %s1637_s13 = scalar_select %p1446_p13, 1, 0 }
  0x26   : > { %1077 = dma.hbm_to_vmem [thread:$0]  (!%p1422_p10), %s1635_s1, 2048, %s198_s29, [#allocation6], %s1327_s7, %s1327_s7, %s1328_s8  }
  0x27   : > { %p47_p10 = scmp.eq.s32.totalorder %s44_s14, 0  ;;  %s223_s21 = sand.u32 1, %s1312_s17  }
  0x28   : > { %s936_s22 = sshll.u32 %s223_s21, 7  ;;  %s984_s29 = sshll.u32 %s1320_s19, 11 }
  0x29   : > { %s1455_s28 = scalar_select %p47_p10, %s1312_s17, %s49_s11  }
  0x2a   : > { %s236_s7 = scalar_lea.hbm %s1622_s0, %s984_s29  ;;  %s227_s8 = scalar_lea.vmem [#allocation2], %s936_s22 }
  0x2b   : > { %s237_s9 = sshll.u32 %s227_s8, 4  ;;  %p1463_p2 = pnand %p1087_p0, %p1440_p12  ;;  %s238_s9 = int_to_ptr.vmem [resolvable:$true] %s237_s9 }
  0x2c   : > { %s224_s10 = scalar_lea.sflag [#allocation3], %s223_s21  ;;  %s1225_s14 = scalar_lea.vmem %s238_s9, 2048 }
  0x2d   : > { %p1214_p3 = pneg %p1463_p2  ;;  %p1226_p5 = scmp.ne.s32.totalorder %s238_s9, %s1225_s14 }
  0x2e   : > { %s1329_s11 = smov [#allocation2]  }
  0x2f   : > { %p1228_p7 = pnand %p1226_p5, %p1214_p3  ;;  %s1230_s1 = sshll.u32 %s1329_s11, 4  ;;  %s1231_s1 = int_to_ptr.vmem [resolvable:$false] %s1230_s1 }
  0x30   : > { %s1232_s29 = scalar_lea.vmem %s1231_s1, 4096  ;;  %p1233_p6 = scmp.lt.s32.totalorder %s238_s9, %s1231_s1 }
  0x31   : > { %p1229_p9 = pneg %p1228_p7  ;;  %p1234_p11 = scmp.lt.s32.totalorder %s1232_s29, %s1225_s14 }
  0x33   : > { %p1235_p10 = por %p1234_p11, %p1233_p6 }
  0x35   : > { %p1236_p13 = pnand %p1235_p10, %p1229_p9 }
  0x37   : > { %1239 = shalt.err (!%p1236_p13)
}
  0x38   : > { %s1330_s12 = smov 128   ;;  %s1331_s22 = smov 8  }
  0x39   : > { %1081 = dma.hbm_to_vmem [thread:$0]  (!%p1463_p2), %s236_s7, 2048, %s238_s9, %s224_s10, %s1330_s12, %s1330_s12, %s1331_s22  }
  0x3a   : > { %249 = sbr.rel (%p1414_p8) target bundleno = 344 (0x158), region = 36  ;;  %s1474_s21 = sand.u32 (!%p1414_p8), 1, %s1308_s16  }
  0x3b   : > { %s941_s1 = sshll.u32 (!%p1414_p8), %s1474_s21, 7  ;;  %s252_s30 = scalar_lea.sflag (!%p1414_p8), [#allocation3], %s1474_s21 }
  0x3c   : > { %s1480_s6 = scalar_lea.vmem (!%p1414_p8), [#allocation2], %s941_s1 }
  0x3f   : > { %1291 = dma.done.wait (%p1404_p4), %s252_s30, 2048  }
  0x40   : > { %1293 = vsyncadd (%p1404_p4), %s252_s30, 4294965248 }
  0x41   : > { %1295 = dma.done.wait (%p1394_p1), [#allocation6], 2048  }
  0x42   : > { %1297 = vsyncadd (%p1394_p1), [#allocation6], 4294965248  ;;  %v1146_v0 = vld [vmem:[#allocation5 + $0x78] sm:$0xff]   ;;  %v1148_v2 = vld [vmem:[#allocation5 + $0x70] sm:$0xff]   ;;  %s1524_s8 = scalar_lea.vmem [#allocation7], %s941_s1  ;;  %s985_s9 = sshll.u32 %s1316_s18, 11 }
  0x43   : > { %v1147_v1 = vld [vmem:[#allocation5 + $0x38] sm:$0xff]   ;;  %986 = vmatprep.subr.bf16.mxu0 %v1146_v0  ;;  %1050 = vmatprep.subr.bf16.mxu1 %v1146_v0  ;;  %v1149_v3 = vld [vmem:[#allocation5 + $0x30] sm:$0xff]   ;;  %v1150_v4 = vld [vmem:[#allocation5 + $0x68] sm:$0xff]   ;;  %s802_s24 = sshll.u32 %s1524_s8, 4  ;;  %s1571_s11 = scalar_lea.hbm %s1626_s4, %s985_s9  ;;  %s1573_s24 = int_to_ptr.vmem [resolvable:$true] %s802_s24 }
  0x44   : > { %987 = vmatpush3.bf16.msra.mxu0 %v1147_v1  ;;  %1058 = vmatpush3.bf16.msra.mxu1 %v1147_v1  ;;  %v1151_v5 = vld [vmem:[#allocation5 + $0x28] sm:$0xff]   ;;  %v1152_v6 = vld [vmem:[#allocation5 + $0x60] sm:$0xff]   ;;  %v1154_v8 = vld [vmem:[#allocation5 + $0x58] sm:$0xff]   ;;  %s788_s18 = scalar_lea.sflag [#allocation4], %s1474_s21  ;;  %s1240_s29 = scalar_lea.vmem %s1573_s24, 2048 }
  0x45   : > { %988 = vmatprep.subr.bf16.mxu0 %v1148_v2  ;;  %1051 = vmatprep.subr.bf16.mxu1 %v1148_v2  ;;  %v1153_v7 = vld [vmem:[#allocation5 + $0x20] sm:$0xff]   ;;  %v1155_v9 = vld [vmem:[#allocation5 + $0x18] sm:$0xff]   ;;  %v1156_v10 = vld [vmem:[#allocation5 + $0x50] sm:$0xff]   ;;  %p1241_p1 = scmp.ne.s32.totalorder %s1573_s24, %s1240_s29  ;;  %p1639_p4 = scmp.ne.s32.totalorder %s1637_s13, 0 }
  0x46   : > { %v1164_v11 = vld [vmem:[%s1480_s6 + $0x4] ss:$8 sps:$4 sm:$0xff]   ;;  %v1157_v13 = vld [vmem:[#allocation5 + $0x10] sm:$0xff]   ;;  %v1162_v18 = vld [vmem:[%s1480_s6] ss:$8 sps:$4 sm:$0xff]   ;;  %s1332_s12 = smov [#allocation7]  }
  0x47   : > { %v1167_v12 = vld [vmem:[%s1480_s6 + $0x44] ss:$8 sps:$4 sm:$0xff]   ;;  %593 = vmatprep.mubr.bf16.mxu0 %v1164_v11  ;;  %v1165_v19 = vld [vmem:[%s1480_s6 + $0x40] ss:$8 sps:$4 sm:$0xff]   ;;  %v1168_v20 = vld [vmem:[%s1480_s6 + $0x14] ss:$8 sps:$4 sm:$0xff]   ;;  %p1242_p8 = pnand %p1241_p1, %p1639_p4 }
  0x48   : > { %989 = vmatpush3.bf16.msra.mxu0 %v1149_v3  ;;  %1059 = vmatpush3.bf16.msra.mxu1 %v1149_v3  ;;  %v1158_v14 = vld [vmem:[#allocation5 + $0x48] sm:$0xff]   ;;  %v1160_v16 = vld [vmem:[#allocation5 + $0x40] sm:$0xff]   ;;  %v1170_v21 = vld [vmem:[%s1480_s6 + $0x54] ss:$8 sps:$4 sm:$0xff]   ;;  %s1244_s22 = sshll.u32 %s1332_s12, 4  ;;  %s1245_s22 = int_to_ptr.vmem [resolvable:$false] %s1244_s22 }
  0x49   : > { %990 = vmatprep.subr.bf16.mxu0 %v1150_v4  ;;  %1052 = vmatprep.subr.bf16.mxu1 %v1150_v4  ;;  %v1159_v15 = vld [vmem:[#allocation5 + $0x8] sm:$0xff]   ;;  %v1161_v17 = vld [vmem:[#allocation5] sm:$0xff]   ;;  %v1172_v22 = vld [vmem:[%s1480_s6 + $0x10] ss:$8 sps:$4 sm:$0xff]   ;;  %p1243_p12 = pneg %p1242_p8  ;;  %s1246_s1 = scalar_lea.vmem %s1245_s22, 4096 }
  0x4a   : > { %625 = vmatprep.mubr.bf16.mxu1 %v1167_v12  ;;  %v1173_v23 = vld [vmem:[%s1480_s6 + $0x50] ss:$8 sps:$4 sm:$0xff]   ;;  %v1174_v24 = vld [vmem:[%s1480_s6 + $0x24] ss:$8 sps:$4 sm:$0xff]   ;;  %v1178_v26 = vld [vmem:[%s1480_s6 + $0x20] ss:$8 sps:$4 sm:$0xff]   ;;  %p1247_p13 = scmp.lt.s32.totalorder %s1573_s24, %s1245_s22  ;;  %p1248_p0 = scmp.lt.s32.totalorder %s1246_s1, %s1240_s29 }
  0x4b   : > { %v1176_v25 = vld [vmem:[%s1480_s6 + $0x64] ss:$8 sps:$4 sm:$0xff]   ;;  %v1179_v27 = vld [vmem:[%s1480_s6 + $0x60] ss:$8 sps:$4 sm:$0xff]   ;;  %v1180_v28 = vld [vmem:[%s1480_s6 + $0x34] ss:$8 sps:$4 sm:$0xff]  }
  0x4c   : > { %991 = vmatpush3.bf16.msra.mxu0 %v1151_v5  ;;  %1060 = vmatpush3.bf16.msra.mxu1 %v1151_v5  ;;  %v1182_v29 = vld [vmem:[%s1480_s6 + $0x74] ss:$8 sps:$4 sm:$0xff]   ;;  %v1184_v30 = vld [vmem:[%s1480_s6 + $0x30] ss:$8 sps:$4 sm:$0xff]   ;;  %v1509_v38 = vld [vmem:[%s1624_s2] ss:$0 sm:$0xff]  ;;  %p1249_p2 = por %p1248_p0, %p1247_p13 }
  0x4d   : > { %992 = vmatprep.subr.bf16.mxu0 %v1152_v6  ;;  %1053 = vmatprep.subr.bf16.mxu1 %v1152_v6  ;;  %v1185_v31 = vld [vmem:[%s1480_s6 + $0x70] ss:$8 sps:$4 sm:$0xff]   ;;  %v1514_v41 = vld [vmem:[%s1625_s3] ss:$0 sm:$0xff] }
  0x4e   : > { %p1250_p3 = pnand %p1249_p2, %p1243_p12 }
  0x50   : > { %993 = vmatpush3.bf16.msra.mxu0 %v1153_v7  ;;  %1061 = vmatpush3.bf16.msra.mxu1 %v1153_v7 }
  0x51   : > { %994 = vmatprep.subr.bf16.mxu0 %v1154_v8  ;;  %1054 = vmatprep.subr.bf16.mxu1 %v1154_v8 }
  0x54   : > { %995 = vmatpush3.bf16.msra.mxu0 %v1155_v9  ;;  %1062 = vmatpush3.bf16.msra.mxu1 %v1155_v9 }
  0x55   : > { %996 = vmatprep.subr.bf16.mxu0 %v1156_v10  ;;  %1055 = vmatprep.subr.bf16.mxu1 %v1156_v10 }
  0x58   : > { %997 = vmatpush3.bf16.msra.mxu0 %v1157_v13  ;;  %1063 = vmatpush3.bf16.msra.mxu1 %v1157_v13 }
  0x59   : > { %998 = vmatprep.subr.bf16.mxu0 %v1158_v14  ;;  %1056 = vmatprep.subr.bf16.mxu1 %v1158_v14 }
  0x5c   : > { %999 = vmatpush3.bf16.msra.mxu0 %v1159_v15  ;;  %1064 = vmatpush3.bf16.msra.mxu1 %v1159_v15 }
  0x5d   : > { %1000 = vmatprep.subr.bf16.mxu0 %v1160_v16  ;;  %1057 = vmatprep.subr.bf16.mxu1 %v1160_v16 }
  0x60   : > { %1001 = vmatpush3.bf16.msra.mxu0 %v1161_v17  ;;  %1065 = vmatpush3.bf16.msra.mxu1 %v1161_v17 }
  0x63   : > { %594 = vmatmul.mubr.bf16.vlgmr.msra.gmra.mxu0 %v1162_v18  ;;  %626 = vmatmul.mubr.bf16.vlgmr.msra.gmra.mxu1 %v1165_v19 }
  0x64   : > { %601 = vmatprep.mubr.bf16.mxu0 %v1168_v20  ;;  %633 = vmatprep.mubr.bf16.mxu1 %v1170_v21 }
  0x6b   : > { %602 = vmatmul.mubr.bf16.gmra.mxu0 %v1172_v22  ;;  %634 = vmatmul.mubr.bf16.gmra.mxu1 %v1173_v23 }
  0x6c   : > { %609 = vmatprep.mubr.bf16.mxu0 %v1174_v24  ;;  %641 = vmatprep.mubr.bf16.mxu1 %v1176_v25 }
  0x73   : > { %610 = vmatmul.mubr.bf16.gmra.mxu0 %v1178_v26  ;;  %642 = vmatmul.mubr.bf16.gmra.mxu1 %v1179_v27 }
  0x74   : > { %617 = vmatprep.mubr.bf16.mxu0 %v1180_v28  ;;  %649 = vmatprep.mubr.bf16.mxu1 %v1182_v29 }
  0x7b   : > { %618 = vmatmul.mubr.bf16.gmra.mxu0 %v1184_v30  ;;  %650 = vmatmul.mubr.bf16.gmra.mxu1 %v1185_v31 }
 0x123   : > { %v1002_v32 = vpop.f32.mrf.mxu0  ;;  %v1026_v33 = vpop.f32.mrf.mxu1 }
 0x125   : > { %v1003_v34 = vpop.f32.mrf.mxu0  ;;  %v1027_v35 = vpop.f32.mrf.mxu1 }
 0x126   : > { %v1004_v36 = vadd.f32 %v1003_v34, %v1002_v32  ;;  %v1028_v37 = vadd.f32 %v1027_v35, %v1026_v33 }
 0x127   : > { %v1005_v39 = vpop.f32.mrf.mxu0  ;;  %v1029_v40 = vpop.f32.mrf.mxu1 }
 0x128   : > { %v716_v44 = vmul.f32 %v1004_v36, %v1509_v38  ;;  %v724_v45 = vmul.f32 %v1028_v37, %v1509_v38 }
 0x129   : > { %v1006_v42 = vpop.f32.mrf.mxu0  ;;  %v1030_v43 = vpop.f32.mrf.mxu1 }
 0x12a   : > { %v1007_v46 = vadd.f32 %v1006_v42, %v1005_v39  ;;  %v1031_v47 = vadd.f32 %v1030_v43, %v1029_v40  ;;  %v739_v50 = vadd.f32 %v1514_v41, %v716_v44  ;;  %v747_v51 = vadd.f32 %v1514_v41, %v724_v45 }
 0x12b   : > { %v1008_v48 = vpop.f32.mrf.mxu0  ;;  %v1032_v49 = vpop.f32.mrf.mxu1 }
 0x12c   : > { %v755_v54 = vmax.f32 %v739_v50, 0.0  ;;  %v763_v55 = vmax.f32 %v747_v51, 0.0  ;;  %v717_v56 = vmul.f32 %v1007_v46, %v1509_v38  ;;  %v725_v57 = vmul.f32 %v1031_v47, %v1509_v38 }
 0x12d   : > { %v1009_v52 = vpop.f32.mrf.mxu0  ;;  %v1033_v53 = vpop.f32.mrf.mxu1 }
 0x12e   : > { %v1010_v58 = vadd.f32 %v1009_v52, %v1008_v48  ;;  %v1034_v59 = vadd.f32 %v1033_v53, %v1032_v49  ;;  %771 = vst [vmem:[%s1524_s8] sm:$0xff] %v755_v54  ;;  %779 = vst [vmem:[%s1524_s8 + $0x40] sm:$0xff] %v763_v55  ;;  %v740_v62 = vadd.f32 %v1514_v41, %v717_v56 }
 0x12f   : > { %v1011_v60 = vpop.f32.mrf.mxu0  ;;  %v1035_v61 = vpop.f32.mrf.mxu1  ;;  %v748_v63 = vadd.f32 %v1514_v41, %v725_v57 }
 0x130   : > { %v756_v2 = vmax.f32 %v740_v62, 0.0  ;;  %v718_v6 = vmul.f32 %v1010_v58, %v1509_v38  ;;  %v726_v7 = vmul.f32 %v1034_v59, %v1509_v38 }
 0x131   : > { %v1012_v0 = vpop.f32.mrf.mxu0  ;;  %v1036_v1 = vpop.f32.mrf.mxu1  ;;  %v764_v3 = vmax.f32 %v748_v63, 0.0 }
 0x132   : > { %v1013_v4 = vadd.f32 %v1012_v0, %v1011_v60  ;;  %v1037_v5 = vadd.f32 %v1036_v1, %v1035_v61  ;;  %772 = vst [vmem:[%s1524_s8 + $0x8] sm:$0xff] %v756_v2  ;;  %v741_v10 = vadd.f32 %v1514_v41, %v718_v6  ;;  %v749_v11 = vadd.f32 %v1514_v41, %v726_v7 }
 0x133   : > { %v1014_v8 = vpop.f32.mrf.mxu0  ;;  %v1038_v9 = vpop.f32.mrf.mxu1  ;;  %780 = vst [vmem:[%s1524_s8 + $0x48] sm:$0xff] %v764_v3 }
 0x134   : > { %v719_v14 = vmul.f32 %v1013_v4, %v1509_v38  ;;  %v727_v15 = vmul.f32 %v1037_v5, %v1509_v38  ;;  %v757_v18 = vmax.f32 %v741_v10, 0.0  ;;  %v765_v19 = vmax.f32 %v749_v11, 0.0 }
 0x135   : > { %v1015_v12 = vpop.f32.mrf.mxu0  ;;  %v1039_v13 = vpop.f32.mrf.mxu1 }
 0x136   : > { %v1016_v16 = vadd.f32 %v1015_v12, %v1014_v8  ;;  %v1040_v17 = vadd.f32 %v1039_v13, %v1038_v9  ;;  %v742_v22 = vadd.f32 %v1514_v41, %v719_v14  ;;  %v750_v23 = vadd.f32 %v1514_v41, %v727_v15  ;;  %773 = vst [vmem:[%s1524_s8 + $0x10] sm:$0xff] %v757_v18 }
 0x137   : > { %v1017_v20 = vpop.f32.mrf.mxu0  ;;  %v1041_v21 = vpop.f32.mrf.mxu1  ;;  %781 = vst [vmem:[%s1524_s8 + $0x50] sm:$0xff] %v765_v19 }
 0x138   : > { %v758_v26 = vmax.f32 %v742_v22, 0.0  ;;  %v766_v27 = vmax.f32 %v750_v23, 0.0  ;;  %v720_v28 = vmul.f32 %v1016_v16, %v1509_v38  ;;  %v728_v29 = vmul.f32 %v1040_v17, %v1509_v38 }
 0x139   : > { %v1018_v24 = vpop.f32.mrf.mxu0  ;;  %v1042_v25 = vpop.f32.mrf.mxu1 }
 0x13a   : > { %v1019_v30 = vadd.f32 %v1018_v24, %v1017_v20  ;;  %v1043_v31 = vadd.f32 %v1042_v25, %v1041_v21  ;;  %774 = vst [vmem:[%s1524_s8 + $0x18] sm:$0xff] %v758_v26  ;;  %782 = vst [vmem:[%s1524_s8 + $0x58] sm:$0xff] %v766_v27  ;;  %v743_v34 = vadd.f32 %v1514_v41, %v720_v28 }
 0x13b   : > { %v1020_v32 = vpop.f32.mrf.mxu0  ;;  %v1044_v33 = vpop.f32.mrf.mxu1  ;;  %v751_v35 = vadd.f32 %v1514_v41, %v728_v29 }
 0x13c   : > { %v759_v39 = vmax.f32 %v743_v34, 0.0  ;;  %v721_v44 = vmul.f32 %v1019_v30, %v1509_v38  ;;  %v729_v45 = vmul.f32 %v1043_v31, %v1509_v38 }
 0x13d   : > { %v1021_v36 = vpop.f32.mrf.mxu0  ;;  %v1045_v37 = vpop.f32.mrf.mxu1  ;;  %v767_v40 = vmax.f32 %v751_v35, 0.0 }
 0x13e   : > { %v1022_v42 = vadd.f32 %v1021_v36, %v1020_v32  ;;  %v1046_v43 = vadd.f32 %v1045_v37, %v1044_v33  ;;  %775 = vst [vmem:[%s1524_s8 + $0x20] sm:$0xff] %v759_v39  ;;  %v744_v48 = vadd.f32 %v1514_v41, %v721_v44  ;;  %v752_v49 = vadd.f32 %v1514_v41, %v729_v45 }
 0x13f   : > { %v1023_v46 = vpop.f32.mrf.mxu0  ;;  %v1047_v47 = vpop.f32.mrf.mxu1  ;;  %783 = vst [vmem:[%s1524_s8 + $0x60] sm:$0xff] %v767_v40 }
 0x140   : > { %v722_v52 = vmul.f32 %v1022_v42, %v1509_v38  ;;  %v730_v53 = vmul.f32 %v1046_v43, %v1509_v38  ;;  %v760_v56 = vmax.f32 %v744_v48, 0.0  ;;  %v768_v57 = vmax.f32 %v752_v49, 0.0 }
 0x141   : > { %v1024_v50 = vpop.f32.mrf.mxu0  ;;  %v1048_v51 = vpop.f32.mrf.mxu1 }
 0x142   : > { %v1025_v54 = vadd.f32 %v1024_v50, %v1023_v46  ;;  %v1049_v55 = vadd.f32 %v1048_v51, %v1047_v47  ;;  %v745_v58 = vadd.f32 %v1514_v41, %v722_v52  ;;  %v753_v59 = vadd.f32 %v1514_v41, %v730_v53  ;;  %776 = vst [vmem:[%s1524_s8 + $0x28] sm:$0xff] %v760_v56 }
 0x143   : > { %784 = vst [vmem:[%s1524_s8 + $0x68] sm:$0xff] %v768_v57 }
 0x144   : > { %v761_v60 = vmax.f32 %v745_v58, 0.0  ;;  %v769_v61 = vmax.f32 %v753_v59, 0.0  ;;  %v723_v62 = vmul.f32 %v1025_v54, %v1509_v38  ;;  %v731_v63 = vmul.f32 %v1049_v55, %v1509_v38 }
 0x146   : > { %777 = vst [vmem:[%s1524_s8 + $0x30] sm:$0xff] %v761_v60  ;;  %785 = vst [vmem:[%s1524_s8 + $0x70] sm:$0xff] %v769_v61  ;;  %v746_v0 = vadd.f32 %v1514_v41, %v723_v62  ;;  %v754_v1 = vadd.f32 %v1514_v41, %v731_v63 }
 0x148   : > { %v762_v38 = vmax.f32 %v746_v0, 0.0  ;;  %v770_v2 = vmax.f32 %v754_v1, 0.0 }
 0x14a   : > { %778 = vst [vmem:[%s1524_s8 + $0x38] sm:$0xff] %v762_v38  ;;  %786 = vst [vmem:[%s1524_s8 + $0x78] sm:$0xff] %v770_v2 }
 0x14b   : > { %1253 = shalt.err (!%p1250_p3)
}
 0x14c   : > { %s1254_s30 = scalar_lea.hbm %s1571_s11, 2048  ;;  %s1258_s25 = scalar_lea.hbm %s1626_s4, 8192 }
 0x14d   : > { %p1255_p5 = scmp.ne.s32.totalorder %s1571_s11, %s1254_s30  ;;  %p1259_p6 = scmp.lt.s32.totalorder %s1571_s11, %s1626_s4 }
 0x14e   : > { %p1260_p11 = scmp.lt.s32.totalorder %s1258_s25, %s1254_s30 }
 0x14f   : > { %p1256_p7 = pnand %p1255_p5, %p1639_p4 }
 0x150   : > { %p1261_p10 = por %p1260_p11, %p1259_p6 }
 0x151   : > { %p1257_p9 = pneg %p1256_p7 }
 0x153   : > { %p1262_p1 = pnand %p1261_p10, %p1257_p9 }
 0x155   : > { %1265 = shalt.err (!%p1262_p1)
}
 0x156   : > { %s1333_s8 = smov 128   ;;  %s1334_s9 = smov 8  }
 0x157   : > { %1072 = dma.vmem_to_hbm [thread:$0]  (%p1639_p4), %s1573_s24, 2048, %s1571_s11, %s788_s18, %s1333_s8, %s1333_s8, %s1334_s9  }
 0x158 PF: > { %p1089_p8 = scmp.ge.s32.totalorder %s1324_s20, 2  ;;  %s817_s10 = sand.u32 1, %s1304_s15  }
 0x159   : > { %p1640_p12 = scmp.ne.s32.totalorder %s1632_s26, 0  ;;  %s818_s14 = scalar_lea.sflag [#allocation4], %s817_s10 }
 0x15b   : > { %p1083_p13 = pnand %p1089_p8, %p1640_p12 }
 0x15d   : > { %p1084_p0 = pneg %p1083_p13 }
 0x15f   : > { %1299 = dma.done.wait (%p1084_p0), %s818_s14, 2048  }
 0x160   : > { %1301 = vsyncadd (%p1084_p0), %s818_s14, 4294965248  ;;  %s21_s20 = sadd.s32 1, %s1324_s20   ;;  %s1641_s15 = smov %s1308_s16 }
 0x161   : > { %p18_p2 = scmp.ge.s32.totalorder %s21_s20, 6   ;;  %s1642_s16 = smov %s1312_s17 }
 0x162   : > { %s1643_s17 = smov %s1455_s28  ;;  %s1644_s18 = smov %s1320_s19 }
 0x163   : > { %s1645_s19 = smov %s1647_s5  ;;  %20 = sbr.rel (!%p18_p2) target bundleno = 9 (0x9), region = 100 }
 0x168   :  { %823 = vsyncpa [#allocation3], 1 }
 0x169   :  { %825 = vsyncpa [#allocation3 + $0x1], 1 }
 0x16a   :  { %826 = vsyncpa [#allocation6], 1 }
 0x16b   :  { %827 = vsyncpa [#allocation4], 1 }
 0x16c   :  { %829 = vsyncpa [#allocation4 + $0x1], 1 }

</bundles_post_ra>
